<compile_context>
chip_gen: v6e
topology: v6e:2x2x1
jax: 0.10.0
libtpu: 0.0.40
codegen_flags: <defaults>
</compile_context>

<pallas_src>
import jax
import jax.numpy as jnp
from jax.experimental import pallas as pl
from jax.experimental.pallas import tpu as pltpu


def _round_up(n, m):
    return ((n + m - 1) // m) * m


def mlp_kernel(x_ref, w1_ref, b1_ref, w2_ref, b2_ref, w3_ref, b3_ref, o_ref):
    # x arrives as f32 straight from HBM (no wrapper-side padded bf16 copy);
    # cast to bf16 in-register for the MXU, accumulate in f32.
    x = x_ref[...].astype(jnp.bfloat16)
    # fc1 + ReLU
    h1 = jnp.dot(x, w1_ref[...], preferred_element_type=jnp.float32)
    h1 = jnp.maximum(h1 + b1_ref[...], 0.0).astype(jnp.bfloat16)
    # fc2 + ReLU
    h2 = jnp.dot(h1, w2_ref[...], preferred_element_type=jnp.float32)
    h2 = jnp.maximum(h2 + b2_ref[...], 0.0).astype(jnp.bfloat16)
    # fc3 (logits, no activation)
    out = jnp.dot(h2, w3_ref[...], preferred_element_type=jnp.float32)
    o_ref[...] = (out + b3_ref[...]).astype(o_ref.dtype)


def prepare_params(params):
    """One-time prep (call at init, not per forward): pad hidden/output feature
    dims to lane-dense multiples of 128 and cast weights to bf16.  The fc1
    contraction dim stays at its natural size (784) so f32 x needs no feature
    padding at runtime.  Zero padding is exact (padded cols stay 0 through
    bias-add and ReLU)."""
    w1, b1, w2, b2, w3, b3 = (params[k] for k in ("w1", "b1", "w2", "b2", "w3", "b3"))
    in_f, hid = w1.shape
    out_f = w3.shape[1]
    hid_p = _round_up(hid, 128)   # 200 -> 256
    out_p = _round_up(out_f, 128)  # 10  -> 128
    bf16 = jnp.bfloat16
    return {
        "w1": jnp.pad(w1, ((0, 0), (0, hid_p - hid))).astype(bf16),
        "b1": jnp.pad(b1, ((0, 0), (0, hid_p - hid))).astype(jnp.float32),
        "w2": jnp.pad(w2, ((0, hid_p - hid), (0, hid_p - hid))).astype(bf16),
        "b2": jnp.pad(b2, ((0, 0), (0, hid_p - hid))).astype(jnp.float32),
        "w3": jnp.pad(w3, ((0, hid_p - hid), (0, out_p - out_f))).astype(bf16),
        "b3": jnp.pad(b3, ((0, 0), (0, out_p - out_f))).astype(jnp.float32),
        "in_features": in_f,
        "out_features": out_f,
    }


def _choose_tiling(B, tb):
    """Small batches (<=256): single grid step, batch padded only to 16 rows.
    Large batches: tiles of `tb` rows (multiple of 256), capped so there are at
    least 2 grid steps (both TensorCores on v7x get work)."""
    if B <= 256:
        bp = _round_up(max(B, 16), 16)
        return bp, bp
    tb = max(256, (tb // 256) * 256)
    half = _round_up((B + 1) // 2, 256)
    tb = min(tb, half)
    bp = _round_up(B, tb)
    return bp, tb


def mnist_mlp_forward(x, prepared, tb=512):
    """x: (B, 784) float32.  prepared: output of prepare_params().

    Weights are stored as (in_features, out_features): y = x @ W + b
    (the transpose of PyTorch nn.Linear's weight layout)."""
    w1, b1, w2, b2, w3, b3 = (prepared[k] for k in ("w1", "b1", "w2", "b2", "w3", "b3"))
    out_f = prepared["out_features"]
    B, in_f = x.shape
    assert in_f == prepared["in_features"], (in_f, prepared["in_features"])
    hid_p = w1.shape[1]
    out_p = w3.shape[1]

    bp, tb = _choose_tiling(B, tb)
    xp = x.astype(jnp.float32)
    if bp != B:
        xp = jnp.pad(xp, ((0, bp - B), (0, 0)))  # batch-dim pad only

    grid = (bp // tb,)
    flops = 2 * bp * (in_f * hid_p + hid_p * hid_p + hid_p * out_p)
    bytes_accessed = (
        xp.size * 4
        + (w1.size + w2.size + w3.size) * 2
        + (b1.size + b2.size + b3.size) * 4
        + bp * out_p * 4
    )

    out = pl.pallas_call(
        mlp_kernel,
        out_shape=jax.ShapeDtypeStruct((bp, out_p), jnp.float32),
        grid_spec=pltpu.PrefetchScalarGridSpec(
            num_scalar_prefetch=0,
            grid=grid,
            in_specs=[
                pl.BlockSpec((tb, in_f), lambda i: (i, 0)),      # x tile (f32, pipelined)
                pl.BlockSpec((in_f, hid_p), lambda i: (0, 0)),   # w1 (VMEM-resident)
                pl.BlockSpec((1, hid_p), lambda i: (0, 0)),      # b1
                pl.BlockSpec((hid_p, hid_p), lambda i: (0, 0)),  # w2
                pl.BlockSpec((1, hid_p), lambda i: (0, 0)),      # b2
                pl.BlockSpec((hid_p, out_p), lambda i: (0, 0)),  # w3
                pl.BlockSpec((1, out_p), lambda i: (0, 0)),      # b3
            ],
            out_specs=pl.BlockSpec((tb, out_p), lambda i: (i, 0)),
        ),
        compiler_params=pltpu.CompilerParams(
            dimension_semantics=("parallel",),
        ),
        cost_estimate=pl.CostEstimate(
            flops=flops, transcendentals=0, bytes_accessed=bytes_accessed
        ),
    )(xp, w1, b1, w2, b2, w3, b3)

    return out[:B, :out_f]


def init_params(key, input_size=28 * 28, hidden_size=200, num_classes=10):
    """Deterministic nn.Linear-style init: U(-1/sqrt(fan_in), 1/sqrt(fan_in))."""
    ks = jax.random.split(key, 6)

    def linear(kw, kb, fan_in, fan_out):
        bound = 1.0 / jnp.sqrt(jnp.float32(fan_in))
        w = jax.random.uniform(kw, (fan_in, fan_out), jnp.float32, -bound, bound)
        b = jax.random.uniform(kb, (1, fan_out), jnp.float32, -bound, bound)
        return w, b

    w1, b1 = linear(ks[0], ks[1], input_size, hidden_size)
    w2, b2 = linear(ks[2], ks[3], hidden_size, hidden_size)
    w3, b3 = linear(ks[4], ks[5], hidden_size, num_classes)
    return {"w1": w1, "b1": b1, "w2": w2, "b2": b2, "w3": w3, "b3": b3}


def reference_forward_f32(x, p):
    h1 = jnp.maximum(x @ p["w1"] + p["b1"], 0.0)
    h2 = jnp.maximum(h1 @ p["w2"] + p["b2"], 0.0)
    return h2 @ p["w3"] + p["b3"]


def reference_forward_bf16(x, p):
    """Reference mimicking the kernel's numerics (bf16 matmul in, f32 accumulate)."""
    bf = jnp.bfloat16
    h1 = jnp.dot(x.astype(bf), p["w1"].astype(bf), preferred_element_type=jnp.float32)
    h1 = jnp.maximum(h1 + p["b1"], 0.0).astype(bf)
    h2 = jnp.dot(h1, p["w2"].astype(bf), preferred_element_type=jnp.float32)
    h2 = jnp.maximum(h2 + p["b2"], 0.0).astype(bf)
    out = jnp.dot(h2, p["w3"].astype(bf), preferred_element_type=jnp.float32)
    return out + p["b3"]


if __name__ == "__main__":
    key = jax.random.PRNGKey(0)
    kx, kp, kx2 = jax.random.split(key, 3)

    B, INPUT, HIDDEN, CLASSES = 8, 28 * 28, 200, 10
    x = jax.random.normal(kx, (B, INPUT), jnp.float32)
    params = init_params(kp, INPUT, HIDDEN, CLASSES)
    prepared = prepare_params(params)  # one-time padded/bf16 weights

    # Small-batch path (grid=(1,), batch padded to 16 rows only).
    out = jax.block_until_ready(mnist_mlp_forward(x, prepared))
    ref_bf16 = jax.block_until_ready(reference_forward_bf16(x, params))
    ref_f32 = jax.block_until_ready(reference_forward_f32(x, params))
    assert out.shape == (B, CLASSES), out.shape
    assert jnp.allclose(out, ref_bf16, atol=2e-2, rtol=2e-2), float(
        jnp.max(jnp.abs(out - ref_bf16))
    )
    assert jnp.allclose(out, ref_f32, atol=1e-1, rtol=1e-1), float(
        jnp.max(jnp.abs(out - ref_f32))
    )

    # Larger batch exercising the multi-step tiled (megacore) path.
    B2 = 600
    x2 = jax.random.normal(kx2, (B2, INPUT), jnp.float32)
    out2 = jax.block_until_ready(mnist_mlp_forward(x2, prepared))
    ref2 = jax.block_until_ready(reference_forward_bf16(x2, params))
    assert out2.shape == (B2, CLASSES), out2.shape
    assert jnp.allclose(out2, ref2, atol=2e-2, rtol=2e-2), float(
        jnp.max(jnp.abs(out2 - ref2))
    )

    print("KERNEL_OK")
</pallas_src>

<mosaic_0001>
module attributes {stable_mosaic.version = 11 : i64} {
  func.func @mlp_kernel(%arg0: i32, %arg1: memref<16x784xf32, #tpu.memory_space<vmem>>, %arg2: memref<784x256xbf16, #tpu.memory_space<vmem>>, %arg3: memref<1x256xf32, #tpu.memory_space<vmem>>, %arg4: memref<256x256xbf16, #tpu.memory_space<vmem>>, %arg5: memref<1x256xf32, #tpu.memory_space<vmem>>, %arg6: memref<256x128xbf16, #tpu.memory_space<vmem>>, %arg7: memref<1x128xf32, #tpu.memory_space<vmem>>, %arg8: memref<16x128xf32, #tpu.memory_space<vmem>>) attributes {dimension_semantics = [#tpu.dimension_semantics<parallel>], iteration_bounds = array<i64: 1>, scalar_prefetch = 0 : i64, scratch_operands = 0 : i64, tpu.core_type = #tpu.core_type<tc>, window_params = [{transform_indices = @transform_0, window_bounds = array<i64: 16, 784>}, {pipeline_mode = #tpu.pipeline_mode<synchronous>, transform_indices = @transform_1, window_bounds = array<i64: 784, 256>}, {pipeline_mode = #tpu.pipeline_mode<synchronous>, transform_indices = @transform_2, window_bounds = array<i64: 1, 256>}, {pipeline_mode = #tpu.pipeline_mode<synchronous>, transform_indices = @transform_3, window_bounds = array<i64: 256, 256>}, {pipeline_mode = #tpu.pipeline_mode<synchronous>, transform_indices = @transform_4, window_bounds = array<i64: 1, 256>}, {pipeline_mode = #tpu.pipeline_mode<synchronous>, transform_indices = @transform_5, window_bounds = array<i64: 256, 128>}, {pipeline_mode = #tpu.pipeline_mode<synchronous>, transform_indices = @transform_6, window_bounds = array<i64: 1, 128>}, {transform_indices = @transform_7, window_bounds = array<i64: 16, 128>}]} {
    %c0 = arith.constant 0 : index
    %c0_0 = arith.constant 0 : index
    %0 = vector.load %arg1[%c0, %c0_0] : memref<16x784xf32, #tpu.memory_space<vmem>>, vector<16x784xf32>
    %1 = arith.truncf %0 : vector<16x784xf32> to vector<16x784xbf16>
    %c0_1 = arith.constant 0 : index
    %c0_2 = arith.constant 0 : index
    %2 = vector.load %arg2[%c0_1, %c0_2] : memref<784x256xbf16, #tpu.memory_space<vmem>>, vector<784x256xbf16>
    %cst = arith.constant dense<0.000000e+00> : vector<16x256xf32>
    %3 = tpu.matmul %1, %2, %cst {dimension_numbers = #tpu.dot_dimension_numbers<[1], [0], [0], [1], [0, 0, 1, 1], [], []>} : vector<16x784xbf16>, vector<784x256xbf16>, vector<16x256xf32> -> vector<16x256xf32>
    %c0_3 = arith.constant 0 : index
    %c0_4 = arith.constant 0 : index
    %4 = vector.load %arg3[%c0_3, %c0_4] : memref<1x256xf32, #tpu.memory_space<vmem>>, vector<1x256xf32>
    %5 = vector.broadcast %4 : vector<1x256xf32> to vector<16x256xf32>
    %6 = arith.addf %3, %5 : vector<16x256xf32>
    %cst_5 = arith.constant 0.000000e+00 : f32
    %7 = vector.broadcast %cst_5 : f32 to vector<16x256xf32>
    %8 = arith.maximumf %6, %7 : vector<16x256xf32>
    %9 = arith.truncf %8 : vector<16x256xf32> to vector<16x256xbf16>
    %c0_6 = arith.constant 0 : index
    %c0_7 = arith.constant 0 : index
    %10 = vector.load %arg4[%c0_6, %c0_7] : memref<256x256xbf16, #tpu.memory_space<vmem>>, vector<256x256xbf16>
    %cst_8 = arith.constant dense<0.000000e+00> : vector<16x256xf32>
    %11 = tpu.matmul %9, %10, %cst_8 {dimension_numbers = #tpu.dot_dimension_numbers<[1], [0], [0], [1], [0, 0, 1, 1], [], []>} : vector<16x256xbf16>, vector<256x256xbf16>, vector<16x256xf32> -> vector<16x256xf32>
    %c0_9 = arith.constant 0 : index
    %c0_10 = arith.constant 0 : index
    %12 = vector.load %arg5[%c0_9, %c0_10] : memref<1x256xf32, #tpu.memory_space<vmem>>, vector<1x256xf32>
    %13 = vector.broadcast %12 : vector<1x256xf32> to vector<16x256xf32>
    %14 = arith.addf %11, %13 : vector<16x256xf32>
    %cst_11 = arith.constant 0.000000e+00 : f32
    %15 = vector.broadcast %cst_11 : f32 to vector<16x256xf32>
    %16 = arith.maximumf %14, %15 : vector<16x256xf32>
    %17 = arith.truncf %16 : vector<16x256xf32> to vector<16x256xbf16>
    %c0_12 = arith.constant 0 : index
    %c0_13 = arith.constant 0 : index
    %18 = vector.load %arg6[%c0_12, %c0_13] : memref<256x128xbf16, #tpu.memory_space<vmem>>, vector<256x128xbf16>
    %cst_14 = arith.constant dense<0.000000e+00> : vector<16x128xf32>
    %19 = tpu.matmul %17, %18, %cst_14 {dimension_numbers = #tpu.dot_dimension_numbers<[1], [0], [0], [1], [0, 0, 1, 1], [], []>} : vector<16x256xbf16>, vector<256x128xbf16>, vector<16x128xf32> -> vector<16x128xf32>
    %c0_15 = arith.constant 0 : index
    %c0_16 = arith.constant 0 : index
    %20 = vector.load %arg7[%c0_15, %c0_16] : memref<1x128xf32, #tpu.memory_space<vmem>>, vector<1x128xf32>
    %21 = vector.broadcast %20 : vector<1x128xf32> to vector<16x128xf32>
    %22 = arith.addf %19, %21 : vector<16x128xf32>
    %c0_17 = arith.constant 0 : index
    %c0_18 = arith.constant 0 : index
    %23 = vector.load %arg8[%c0_17, %c0_18] : memref<16x128xf32, #tpu.memory_space<vmem>>, vector<16x128xf32>
    tpu.vector_store %arg8[%c0_17, %c0_18], %22 {strides = array<i32>} : memref<16x128xf32, #tpu.memory_space<vmem>>, vector<16x128xf32>,
    return
  }
  func.func @transform_0(%arg0: i32) -> (i32, i32) {
    %c0_i32 = arith.constant 0 : i32
    %c0_i32_0 = arith.constant 0 : i32
    return %arg0, %c0_i32 : i32, i32
  }
  func.func @transform_1(%arg0: i32) -> (i32, i32) {
    %c0_i32 = arith.constant 0 : i32
    %c0_i32_0 = arith.constant 0 : i32
    %c0_i32_1 = arith.constant 0 : i32
    return %c0_i32, %c0_i32_0 : i32, i32
  }
  func.func @transform_2(%arg0: i32) -> (i32, i32) {
    %c0_i32 = arith.constant 0 : i32
    %c0_i32_0 = arith.constant 0 : i32
    %c0_i32_1 = arith.constant 0 : i32
    return %c0_i32, %c0_i32_0 : i32, i32
  }
  func.func @transform_3(%arg0: i32) -> (i32, i32) {
    %c0_i32 = arith.constant 0 : i32
    %c0_i32_0 = arith.constant 0 : i32
    %c0_i32_1 = arith.constant 0 : i32
    return %c0_i32, %c0_i32_0 : i32, i32
  }
  func.func @transform_4(%arg0: i32) -> (i32, i32) {
    %c0_i32 = arith.constant 0 : i32
    %c0_i32_0 = arith.constant 0 : i32
    %c0_i32_1 = arith.constant 0 : i32
    return %c0_i32, %c0_i32_0 : i32, i32
  }
  func.func @transform_5(%arg0: i32) -> (i32, i32) {
    %c0_i32 = arith.constant 0 : i32
    %c0_i32_0 = arith.constant 0 : i32
    %c0_i32_1 = arith.constant 0 : i32
    return %c0_i32, %c0_i32_0 : i32, i32
  }
  func.func @transform_6(%arg0: i32) -> (i32, i32) {
    %c0_i32 = arith.constant 0 : i32
    %c0_i32_0 = arith.constant 0 : i32
    %c0_i32_1 = arith.constant 0 : i32
    return %c0_i32, %c0_i32_0 : i32, i32
  }
  func.func @transform_7(%arg0: i32) -> (i32, i32) {
    %c0_i32 = arith.constant 0 : i32
    %c0_i32_0 = arith.constant 0 : i32
    return %arg0, %c0_i32 : i32, i32
  }
}

</mosaic_0001>

<bundles_post_ra>
// kernel: tpu_custom_call.1
= control target key start
LH: loop header
LB: loop body
LE: loop exit
PB: predicated region body
PF: predicated region fallthrough
CT: control target
= control target key end

     0   :  { %12 = vsyncpa [#allocation3], 0  ;;  %s1922_s0 = inlined_call_operand.hbm [shape: f32[16,784], index: 0, kind: input, shape index: {}]   ;;  %s1923_s1 = inlined_call_operand.hbm [shape: bf16[784,256], index: 1, kind: input, shape index: {}]   ;;  %s1924_s2 = inlined_call_operand.vmem [shape: f32[1,256], index: 2, kind: input, shape index: {}]   ;;  %s1925_s3 = inlined_call_operand.hbm [shape: bf16[256,256], index: 3, kind: input, shape index: {}]   ;;  %s1926_s4 = inlined_call_operand.vmem [shape: f32[1,256], index: 4, kind: input, shape index: {}]   ;;  %s1927_s5 = inlined_call_operand.hbm [shape: bf16[256,128], index: 5, kind: input, shape index: {}]   ;;  %s1928_s6 = inlined_call_operand.vmem [shape: f32[1,128], index: 6, kind: input, shape index: {}]   ;;  %s1929_s7 = inlined_call_operand.hbm [shape: f32[16,128], index: 7, kind: output, shape index: {}]  }
   0x1   :  { %13 = vsyncpa [#allocation6], 0 }
   0x2   :  { %14 = vsyncpa [#allocation9], 0 }
   0x3   :  { %15 = vsyncpa [#allocation4], 0  ;;  %s1837_s24 = smov [#allocation5]  }
   0x4   :  { %s33_s25 = sshll.u32 %s1837_s24, 4  ;;  %s34_s25 = int_to_ptr.vmem [resolvable:$true] %s33_s25 }
   0x5   :  { %s1737_s26 = scalar_lea.vmem %s34_s25, 12544  ;;  %p1742_p1 = scmp.lt.s32.totalorder %s34_s25, %s34_s25 }
   0x6   :  { %p1738_p0 = scmp.ne.s32.totalorder %s34_s25, %s1737_s26  ;;  %p1743_p2 = scmp.lt.s32.totalorder %s1737_s26, %s1737_s26 }
   0x8   :  { %p1744_p3 = por %p1743_p2, %p1742_p1 }
   0xa   :  { %p1745_p4 = pnand %p1744_p3, %p1738_p0 }
   0xc   :  { %1748 = shalt.err (!%p1745_p4)
}
   0xd   :  { %s1838_s27 = smov 128   ;;  %s1839_s28 = smov 8  }
   0xe   :  { %39 = dma.hbm_to_vmem [thread:$0]  %s1923_s1, 12544, %s34_s25, [#allocation6], %s1838_s27, %s1838_s27, %s1839_s28  }
   0xf   :  { %s1840_s8 = smov [#allocation2]  }
  0x10   :  { %s21_s9 = sshll.u32 %s1840_s8, 4  ;;  %s22_s9 = int_to_ptr.vmem [resolvable:$true] %s21_s9 }
  0x11   :  { %s1757_s10 = scalar_lea.vmem %s22_s9, 1792  ;;  %p1762_p6 = scmp.lt.s32.totalorder %s22_s9, %s22_s9 }
  0x12   :  { %p1758_p5 = scmp.ne.s32.totalorder %s22_s9, %s1757_s10  ;;  %p1763_p7 = scmp.lt.s32.totalorder %s1757_s10, %s1757_s10 }
  0x14   :  { %p1764_p8 = por %p1763_p7, %p1762_p6 }
  0x16   :  { %p1765_p9 = pnand %p1764_p8, %p1758_p5 }
  0x18   :  { %1768 = shalt.err (!%p1765_p9)
}
  0x19   :  { %s1841_s11 = smov 896   ;;  %s1842_s12 = smov 56  }
  0x1a   :  { %27 = dma.hbm_to_vmem [thread:$0]  %s1922_s0, 1792, %s22_s9, [#allocation3], %s1841_s11, %s1841_s11, %s1842_s12  }
  0x1b   :  { %s1843_s15 = smov [#allocation7]   ;;  %s1844_s17 = smov [#allocation8]  }
  0x1c   :  { %s47_s16 = sshll.u32 %s1843_s15, 4  ;;  %s61_s1 = sshll.u32 %s1844_s17, 4  ;;  %s48_s16 = int_to_ptr.vmem [resolvable:$true] %s47_s16  ;;  %s62_s1 = int_to_ptr.vmem [resolvable:$true] %s61_s1 }
  0x1d   :  { %s1777_s18 = scalar_lea.vmem %s48_s16, 4096  ;;  %p1782_p11 = scmp.lt.s32.totalorder %s48_s16, %s48_s16 }
  0x1e   :  { %p1778_p10 = scmp.ne.s32.totalorder %s48_s16, %s1777_s18  ;;  %p1783_p12 = scmp.lt.s32.totalorder %s1777_s18, %s1777_s18 }
  0x20   :  { %p1784_p13 = por %p1783_p12, %p1782_p11 }
  0x22   :  { %p1785_p0 = pnand %p1784_p13, %p1778_p10 }
  0x24   :  { %1788 = shalt.err (!%p1785_p0)
}
  0x25   :  { %53 = dma.hbm_to_vmem [thread:$0]  %s1925_s3, 4096, %s48_s16, [#allocation6], %s1838_s27, %s1838_s27, %s1839_s28  }
  0x26   :  { %s1797_s0 = scalar_lea.vmem %s62_s1, 2048  ;;  %p1802_p2 = scmp.lt.s32.totalorder %s62_s1, %s62_s1 }
  0x27   :  { %p1798_p1 = scmp.ne.s32.totalorder %s62_s1, %s1797_s0  ;;  %p1803_p3 = scmp.lt.s32.totalorder %s1797_s0, %s1797_s0 }
  0x29   :  { %p1804_p4 = por %p1803_p3, %p1802_p2 }
  0x2b   :  { %p1805_p5 = pnand %p1804_p4, %p1798_p1 }
  0x2d   :  { %1808 = shalt.err (!%p1805_p5)
}
  0x2e   :  { %s1845_s21 = smov 64   ;;  %s1846_s22 = smov 4  }
  0x2f   :  { %67 = dma.hbm_to_vmem [thread:$0]  %s1927_s5, 2048, %s62_s1, [#allocation9], %s1845_s21, %s1845_s21, %s1846_s22  }
  0x30   :  { %1829 = dma.done.wait [#allocation3], 1792  }
  0x31   :  { %1830 = vsyncadd [#allocation3], 4294965504 }
  0x32   :  { %1831 = dma.done.wait [#allocation6], 16640  }
  0x33   :  { %1832 = vsyncadd [#allocation6], 4294950656 }
  0x34   :  { %1833 = dma.done.wait [#allocation9], 2048  }
  0x35   :  { %1834 = vsyncadd [#allocation9], 4294965248  ;;  %v1518_v0 = vld [vmem:[#allocation5 + $0x74] ss:$8 sps:$4 sm:$0xff]   ;;  %v1520_v1 = vld [vmem:[#allocation5 + $0x70] ss:$8 sps:$4 sm:$0xff]  }
  0x36   :  { %708 = vmatprep.subr.bf16.mxu0 %v1518_v0  ;;  %v1521_v2 = vld [vmem:[#allocation5 + $0x174] ss:$8 sps:$4 sm:$0xff]   ;;  %v1523_v3 = vld [vmem:[#allocation5 + $0x170] ss:$8 sps:$4 sm:$0xff]   ;;  %v1524_v4 = vld [vmem:[#allocation5 + $0x64] ss:$8 sps:$4 sm:$0xff]  }
  0x37   :  { %709 = vmatpush1.bf16.msra.mxu0 %v1520_v1  ;;  %v1526_v5 = vld [vmem:[#allocation5 + $0x60] ss:$8 sps:$4 sm:$0xff]   ;;  %751 = vmatprep.subr.bf16.mxu1 %v1521_v2  ;;  %v1527_v6 = vld [vmem:[#allocation5 + $0x164] ss:$8 sps:$4 sm:$0xff]   ;;  %v1530_v8 = vld [vmem:[#allocation5 + $0x54] ss:$8 sps:$4 sm:$0xff]  }
  0x38   :  { %752 = vmatpush1.bf16.msra.mxu1 %v1523_v3  ;;  %710 = vmatprep.subr.bf16.mxu0 %v1524_v4  ;;  %v1529_v7 = vld [vmem:[#allocation5 + $0x160] ss:$8 sps:$4 sm:$0xff]   ;;  %v1532_v9 = vld [vmem:[#allocation5 + $0x50] ss:$8 sps:$4 sm:$0xff]   ;;  %v1533_v10 = vld [vmem:[#allocation5 + $0x154] ss:$8 sps:$4 sm:$0xff]  }
  0x39   :  { %753 = vmatprep.subr.bf16.mxu1 %v1527_v6  ;;  %v1536_v11 = vld [vmem:[#allocation5 + $0x44] ss:$8 sps:$4 sm:$0xff]   ;;  %v1535_v12 = vld [vmem:[#allocation5 + $0x150] ss:$8 sps:$4 sm:$0xff]   ;;  %v1538_v14 = vld [vmem:[#allocation5 + $0x40] ss:$8 sps:$4 sm:$0xff]  }
  0x3a   :  { %v1539_v13 = vld [vmem:[#allocation5 + $0x144] ss:$8 sps:$4 sm:$0xff]   ;;  %v1542_v15 = vld [vmem:[#allocation5 + $0x34] ss:$8 sps:$4 sm:$0xff]   ;;  %v1541_v16 = vld [vmem:[#allocation5 + $0x140] ss:$8 sps:$4 sm:$0xff]  }
  0x3b   :  { %711 = vmatpush1.bf16.msra.mxu0 %v1526_v5  ;;  %v1545_v17 = vld [vmem:[#allocation5 + $0x134] ss:$8 sps:$4 sm:$0xff]   ;;  %v1544_v18 = vld [vmem:[#allocation5 + $0x30] ss:$8 sps:$4 sm:$0xff]   ;;  %v1548_v19 = vld [vmem:[#allocation5 + $0x24] ss:$8 sps:$4 sm:$0xff]  }
  0x3c   :  { %712 = vmatprep.subr.bf16.mxu0 %v1530_v8  ;;  %754 = vmatpush1.bf16.msra.mxu1 %v1529_v7  ;;  %v1547_v20 = vld [vmem:[#allocation5 + $0x130] ss:$8 sps:$4 sm:$0xff]   ;;  %v1551_v21 = vld [vmem:[#allocation5 + $0x124] ss:$8 sps:$4 sm:$0xff]   ;;  %v1550_v22 = vld [vmem:[#allocation5 + $0x20] ss:$8 sps:$4 sm:$0xff]  }
  0x3d   :  { %755 = vmatprep.subr.bf16.mxu1 %v1533_v10  ;;  %v1554_v23 = vld [vmem:[#allocation5 + $0x14] ss:$8 sps:$4 sm:$0xff]   ;;  %v1553_v24 = vld [vmem:[#allocation5 + $0x120] ss:$8 sps:$4 sm:$0xff]   ;;  %v1556_v26 = vld [vmem:[#allocation5 + $0x10] ss:$8 sps:$4 sm:$0xff]  }
  0x3e   :  { %v1557_v25 = vld [vmem:[#allocation5 + $0x114] ss:$8 sps:$4 sm:$0xff]   ;;  %v1560_v27 = vld [vmem:[#allocation5 + $0x4] ss:$8 sps:$4 sm:$0xff]   ;;  %v1559_v28 = vld [vmem:[#allocation5 + $0x110] ss:$8 sps:$4 sm:$0xff]  }
  0x3f   :  { %713 = vmatpush1.bf16.msra.mxu0 %v1532_v9  ;;  %v1563_v29 = vld [vmem:[#allocation5 + $0x104] ss:$8 sps:$4 sm:$0xff]   ;;  %v1562_v30 = vld [vmem:[#allocation5] ss:$8 sps:$4 sm:$0xff]   ;;  %v1566_v31 = vld [vmem:[#allocation5 + $0xf4] ss:$8 sps:$4 sm:$0xff]  }
  0x40   :  { %714 = vmatprep.subr.bf16.mxu0 %v1536_v11  ;;  %756 = vmatpush1.bf16.msra.mxu1 %v1535_v12  ;;  %v1565_v32 = vld [vmem:[#allocation5 + $0x100] ss:$8 sps:$4 sm:$0xff]   ;;  %v1569_v33 = vld [vmem:[#allocation5 + $0x1f4] ss:$8 sps:$4 sm:$0xff]   ;;  %v1568_v34 = vld [vmem:[#allocation5 + $0xf0] ss:$8 sps:$4 sm:$0xff]  }
  0x41   :  { %757 = vmatprep.subr.bf16.mxu1 %v1539_v13  ;;  %v1572_v35 = vld [vmem:[#allocation5 + $0xe4] ss:$8 sps:$4 sm:$0xff]   ;;  %v1571_v36 = vld [vmem:[#allocation5 + $0x1f0] ss:$8 sps:$4 sm:$0xff]   ;;  %v1574_v38 = vld [vmem:[#allocation5 + $0xe0] ss:$8 sps:$4 sm:$0xff]  }
  0x42   :  { %v1575_v37 = vld [vmem:[#allocation5 + $0x1e4] ss:$8 sps:$4 sm:$0xff]   ;;  %v1578_v39 = vld [vmem:[#allocation5 + $0xd4] ss:$8 sps:$4 sm:$0xff]   ;;  %v1577_v40 = vld [vmem:[#allocation5 + $0x1e0] ss:$8 sps:$4 sm:$0xff]  }
  0x43   :  { %715 = vmatpush1.bf16.msra.mxu0 %v1538_v14  ;;  %v1581_v41 = vld [vmem:[#allocation5 + $0x1d4] ss:$8 sps:$4 sm:$0xff]   ;;  %v1580_v42 = vld [vmem:[#allocation5 + $0xd0] ss:$8 sps:$4 sm:$0xff]   ;;  %v1584_v43 = vld [vmem:[#allocation5 + $0xc4] ss:$8 sps:$4 sm:$0xff]  }
  0x44   :  { %716 = vmatprep.subr.bf16.mxu0 %v1542_v15  ;;  %758 = vmatpush1.bf16.msra.mxu1 %v1541_v16  ;;  %v1583_v44 = vld [vmem:[#allocation5 + $0x1d0] ss:$8 sps:$4 sm:$0xff]   ;;  %v1587_v45 = vld [vmem:[#allocation5 + $0x1c4] ss:$8 sps:$4 sm:$0xff]   ;;  %v1586_v48 = vld [vmem:[#allocation5 + $0xc0] ss:$8 sps:$4 sm:$0xff]  }
  0x45   :  { %759 = vmatprep.subr.bf16.mxu1 %v1545_v17  ;;  %v84_v46 = vld [vmem:[#allocation2 + $0x8] sm:$0xff]  ;;  %v91_v47 = vld [vmem:[#allocation2 + $0x40] sm:$0xff]  ;;  %v1589_v51 = vld [vmem:[#allocation5 + $0x1c0] ss:$8 sps:$4 sm:$0xff]   ;;  %vm704_vm0 = vcmask 130048   ;;  %s1848_s29 = smov [#allocation10]  }
  0x46   :  { %v98_v49 = vpack.c.bf16 %v91_v47, %v84_v46  ;;  %v1590_v50 = vld [vmem:[#allocation5 + $0xb4] ss:$8 sps:$4 sm:$0xff]   ;;  %v86_v52 = vld [vmem:[#allocation2 + $0x18] sm:$0xff]  ;;  %v93_v53 = vld [vmem:[#allocation2 + $0x50] sm:$0xff]  ;;  %s1322_s30 = sshll.u32 %s1848_s29, 4  ;;  %s1323_s30 = int_to_ptr.vmem [resolvable:$true] %s1322_s30 }
  0x47   :  { %717 = vmatpush1.bf16.msra.mxu0 %v1544_v18  ;;  %v1593_v54 = vld [vmem:[#allocation5 + $0x1b4] ss:$8 sps:$4 sm:$0xff]   ;;  %v100_v55 = vpack.c.bf16 %v93_v53, %v86_v52  ;;  %v1592_v56 = vld [vmem:[#allocation5 + $0xb0] ss:$8 sps:$4 sm:$0xff]   ;;  %v1596_v57 = vld [vmem:[#allocation5 + $0xa4] ss:$8 sps:$4 sm:$0xff]   ;;  %p1814_p7 = scmp.lt.s32.totalorder %s1323_s30, %s1323_s30 }
  0x48   :  { %718 = vmatprep.subr.bf16.mxu0 %v1548_v19  ;;  %760 = vmatpush1.bf16.msra.mxu1 %v1547_v20  ;;  %v1595_v58 = vld [vmem:[#allocation5 + $0x1b0] ss:$8 sps:$4 sm:$0xff]   ;;  %v1599_v59 = vld [vmem:[#allocation5 + $0x1a4] ss:$8 sps:$4 sm:$0xff]   ;;  %v1598_v60 = vld [vmem:[#allocation5 + $0xa0] ss:$8 sps:$4 sm:$0xff]  }
  0x49   :  { %761 = vmatprep.subr.bf16.mxu1 %v1551_v21  ;;  %740 = vmatprep.mubr.bf16.mxu0 %v98_v49  ;;  %v1602_v61 = vld [vmem:[#allocation5 + $0x94] ss:$8 sps:$4 sm:$0xff]   ;;  %v1601_v62 = vld [vmem:[#allocation5 + $0x1a0] ss:$8 sps:$4 sm:$0xff]   ;;  %v1604_v0 = vld [vmem:[#allocation5 + $0x90] ss:$8 sps:$4 sm:$0xff]  }
  0x4a   :  { %783 = vmatprep.mubr.bf16.mxu1 %v100_v55  ;;  %v1605_v63 = vld [vmem:[#allocation5 + $0x194] ss:$8 sps:$4 sm:$0xff]   ;;  %v1607_v1 = vld [vmem:[#allocation5 + $0x190] ss:$8 sps:$4 sm:$0xff]   ;;  %v1608_v2 = vld [vmem:[#allocation5 + $0x84] ss:$8 sps:$4 sm:$0xff]  }
  0x4b   :  { %719 = vmatpush1.bf16.msra.mxu0 %v1550_v22  ;;  %v1610_v3 = vld [vmem:[#allocation5 + $0x80] ss:$8 sps:$4 sm:$0xff]   ;;  %v1611_v4 = vld [vmem:[#allocation5 + $0x184] ss:$8 sps:$4 sm:$0xff]   ;;  %v83_v5 = vld [vmem:[#allocation2] sm:$0xff]  ;;  %v1847_v21 = vmov 0  }
  0x4c   :  { %720 = vmatprep.subr.bf16.mxu0 %v1554_v23  ;;  %762 = vmatpush1.bf16.msra.mxu1 %v1553_v24  ;;  %v1613_v6 = vld [vmem:[#allocation5 + $0x180] ss:$8 sps:$4 sm:$0xff]   ;;  %v1616_v8 = vld [vmem:[#allocation5 + $0x274] ss:$8 sps:$4 sm:$0xff]   ;;  %v1614_v12 = vld [vmem:[#allocation5 + $0x270] ss:$8 sps:$4 sm:$0xff]  }
  0x4d   :  { %763 = vmatprep.subr.bf16.mxu1 %v1557_v25  ;;  %v90_v7 = vld [vmem:[#allocation2 + $0x38] sm:$0xff]  ;;  %v85_v9 = vld [vmem:[#allocation2 + $0x10] sm:$0xff]  ;;  %v92_v10 = vld [vmem:[#allocation2 + $0x48] sm:$0xff]  ;;  %s1809_s8 = scalar_lea.vmem %s1323_s30, 256 }
  0x4e   :  { %v97_v11 = vpack.c.bf16 %v90_v7, %v83_v5  ;;  %v99_v13 = vpack.c.bf16 %v92_v10, %v85_v9  ;;  %v1619_v14 = vld [vmem:[#allocation5 + $0x264] ss:$8 sps:$4 sm:$0xff]   ;;  %v1659_v15 = vld [vmem:[#allocation5 + $0x300] ss:$8 sps:$4 sm:$0xff]   ;;  %v1622_v18 = vld [vmem:[#allocation5 + $0x254] ss:$8 sps:$4 sm:$0xff]   ;;  %p1810_p6 = scmp.ne.s32.totalorder %s1323_s30, %s1809_s8  ;;  %p1815_p8 = scmp.lt.s32.totalorder %s1809_s8, %s1809_s8 }
  0x4f   :  { %721 = vmatpush1.bf16.msra.mxu0 %v1556_v26  ;;  %v1661_v16 = vld [vmem:[#allocation5 + $0x304] ss:$8 sps:$4 sm:$0xff]   ;;  %v1617_v17 = vld [vmem:[#allocation5 + $0x260] ss:$8 sps:$4 sm:$0xff]   ;;  %v88_v19 = vld [vmem:[#allocation2 + $0x28] sm:$0xff] }
  0x50   :  { %722 = vmatprep.subr.bf16.mxu0 %v1560_v27  ;;  %764 = vmatpush1.bf16.msra.mxu1 %v1559_v28  ;;  %v1620_v20 = vld [vmem:[#allocation5 + $0x250] ss:$8 sps:$4 sm:$0xff]   ;;  %v89_v22 = vld [vmem:[#allocation2 + $0x30] sm:$0xff]  ;;  %v1658_v49 = vld [vmem:[#allocation5 + $0x294] ss:$8 sps:$4 sm:$0xff]   ;;  %p1816_p9 = por %p1815_p8, %p1814_p7 }
  0x51   :  { %765 = vmatprep.subr.bf16.mxu1 %v1563_v29  ;;  %v96_v23 = vld [vmem:[#allocation2 + $0x68] sm:$0xff]  ;;  %v95_v24 = vld [vmem:[#allocation2 + $0x60] sm:$0xff]  ;;  %v1625_v25 = vld [vmem:[#allocation5 + $0x244] ss:$8 sps:$4 sm:$0xff]  }
  0x52   :  { %v102_v26 = vpack.c.bf16 %v95_v24, %v88_v19  ;;  %v103_v27 = vpack.c.bf16 %v96_v23, %v89_v22  ;;  %v1623_v28 = vld [vmem:[#allocation5 + $0x240] ss:$8 sps:$4 sm:$0xff]   ;;  %v1628_v29 = vld [vmem:[#allocation5 + $0x234] ss:$8 sps:$4 sm:$0xff]   ;;  %v1650_v46 = vld [vmem:[#allocation5 + $0x2b0] ss:$8 sps:$4 sm:$0xff]   ;;  %p1817_p10 = pnand %p1816_p9, %p1810_p6 }
  0x53   :  { %723 = vmatpush1.bf16.msra.mxu0 %v1562_v30  ;;  %v1626_v30 = vld [vmem:[#allocation5 + $0x230] ss:$8 sps:$4 sm:$0xff]   ;;  %v1655_v47 = vld [vmem:[#allocation5 + $0x2a4] ss:$8 sps:$4 sm:$0xff]   ;;  %v1662_v52 = vld [vmem:[#allocation5 + $0x280] ss:$8 sps:$4 sm:$0xff]  }
  0x54   :  { %724 = vmatprep.subr.bf16.mxu0 %v1566_v31  ;;  %766 = vmatpush1.bf16.msra.mxu1 %v1565_v32  ;;  %v1631_v31 = vld [vmem:[#allocation5 + $0x224] ss:$8 sps:$4 sm:$0xff]   ;;  %v1629_v32 = vld [vmem:[#allocation5 + $0x220] ss:$8 sps:$4 sm:$0xff]   ;;  %v87_v53 = vld [vmem:[#allocation2 + $0x20] sm:$0xff] }
  0x55   :  { %767 = vmatprep.subr.bf16.mxu1 %v1569_v33  ;;  %v1634_v33 = vld [vmem:[#allocation5 + $0x214] ss:$8 sps:$4 sm:$0xff]   ;;  %v1683_v5 = vld [vmem:[#allocation7 + $0x10] ss:$8 sps:$4 sm:$0xff]   ;;  %v1686_v7 = vld [vmem:[#allocation7] ss:$8 sps:$4 sm:$0xff]  }
  0x56   :  { %v1689_v9 = vld [vmem:[#allocation7 + $0xf0] ss:$8 sps:$4 sm:$0xff]   ;;  %v1694_v10 = vld [vmem:[#allocation7 + $0xe4] ss:$8 sps:$4 sm:$0xff]   ;;  %v1704_v19 = vld [vmem:[#allocation7 + $0xa0] ss:$8 sps:$4 sm:$0xff]  }
  0x57   :  { %725 = vmatpush2.bf16.msra.mxu0 %v1568_v34  ;;  %v1632_v34 = vld [vmem:[#allocation5 + $0x210] ss:$8 sps:$4 sm:$0xff]   ;;  %v1712_v22 = vld [vmem:[#allocation7 + $0x84] ss:$8 sps:$4 sm:$0xff]   ;;  %v1713_v24 = vld [vmem:[#allocation8 + $0x78] sm:$0xff]  }
  0x58   :  { %726 = vmatprep.subr.bf16.mxu0 %v1572_v35  ;;  %768 = vmatpush2.bf16.msra.mxu1 %v1571_v36  ;;  %v1637_v35 = vld [vmem:[#allocation5 + $0x204] ss:$8 sps:$4 sm:$0xff]   ;;  %v1635_v36 = vld [vmem:[#allocation5 + $0x200] ss:$8 sps:$4 sm:$0xff]   ;;  %v1710_v23 = vld [vmem:[#allocation7 + $0x80] ss:$8 sps:$4 sm:$0xff]  }
  0x59   :  { %769 = vmatprep.subr.bf16.mxu1 %v1575_v37  ;;  %v1640_v37 = vld [vmem:[#allocation5 + $0x2f4] ss:$8 sps:$4 sm:$0xff]  }
  0x5b   :  { %727 = vmatpush2.bf16.msra.mxu0 %v1574_v38  ;;  %v1638_v38 = vld [vmem:[#allocation5 + $0x2f0] ss:$8 sps:$4 sm:$0xff]  }
  0x5c   :  { %728 = vmatprep.subr.bf16.mxu0 %v1578_v39  ;;  %770 = vmatpush2.bf16.msra.mxu1 %v1577_v40  ;;  %v1643_v39 = vld [vmem:[#allocation5 + $0x2e4] ss:$8 sps:$4 sm:$0xff]   ;;  %v1641_v40 = vld [vmem:[#allocation5 + $0x2e0] ss:$8 sps:$4 sm:$0xff]  }
  0x5d   :  { %771 = vmatprep.subr.bf16.mxu1 %v1581_v41  ;;  %v1646_v41 = vld [vmem:[#allocation5 + $0x2d4] ss:$8 sps:$4 sm:$0xff]  }
  0x5f   :  { %729 = vmatpush2.bf16.msra.mxu0 %v1580_v42  ;;  %v1644_v42 = vld [vmem:[#allocation5 + $0x2d0] ss:$8 sps:$4 sm:$0xff]  }
  0x60   :  { %730 = vmatprep.subr.bf16.mxu0 %v1584_v43  ;;  %772 = vmatpush2.bf16.msra.mxu1 %v1583_v44  ;;  %v1649_v43 = vld [vmem:[#allocation5 + $0x2c4] ss:$8 sps:$4 sm:$0xff]   ;;  %v1647_v44 = vld [vmem:[#allocation5 + $0x2c0] ss:$8 sps:$4 sm:$0xff]  }
  0x61   :  { %773 = vmatprep.subr.bf16.mxu1 %v1587_v45  ;;  %v1652_v45 = vld [vmem:[#allocation5 + $0x2b4] ss:$8 sps:$4 sm:$0xff]  }
  0x63   :  { %731 = vmatpush2.bf16.msra.mxu0 %v1586_v48  ;;  %v1653_v48 = vld [vmem:[#allocation5 + $0x2a0] ss:$8 sps:$4 sm:$0xff]  }
  0x64   :  { %732 = vmatprep.subr.bf16.mxu0 %v1590_v50  ;;  %774 = vmatpush2.bf16.msra.mxu1 %v1589_v51  ;;  %v1656_v50 = vld [vmem:[#allocation5 + $0x290] ss:$8 sps:$4 sm:$0xff]   ;;  %v1664_v51 = vld [vmem:[#allocation5 + $0x284] ss:$8 sps:$4 sm:$0xff]  }
  0x65   :  { %775 = vmatprep.subr.bf16.mxu1 %v1593_v54  ;;  %v94_v54 = vld [vmem:[#allocation2 + $0x58] sm:$0xff] }
  0x66   :  { %v101_v55 = vpack.c.bf16 %v94_v54, %v87_v53 }
  0x67   :  { %733 = vmatpush2.bf16.msra.mxu0 %v1592_v56  ;;  %v1665_v56 = vld [vmem:[#allocation7 + $0x70] ss:$8 sps:$4 sm:$0xff]  }
  0x68   :  { %734 = vmatprep.subr.bf16.mxu0 %v1596_v57  ;;  %776 = vmatpush2.bf16.msra.mxu1 %v1595_v58  ;;  %v1667_v57 = vld [vmem:[#allocation7 + $0x74] ss:$8 sps:$4 sm:$0xff]   ;;  %v1670_v58 = vld [vmem:[#allocation7 + $0x64] ss:$8 sps:$4 sm:$0xff]  }
  0x69   :  { %777 = vmatprep.subr.bf16.mxu1 %v1599_v59  ;;  %v1668_v59 = vld [vmem:[#allocation7 + $0x60] ss:$8 sps:$4 sm:$0xff]  }
  0x6b   :  { %735 = vmatpush2.bf16.msra.mxu0 %v1598_v60  ;;  %v1673_v60 = vld [vmem:[#allocation7 + $0x54] ss:$8 sps:$4 sm:$0xff]  }
  0x6c   :  { %736 = vmatprep.subr.bf16.mxu0 %v1602_v61  ;;  %778 = vmatpush2.bf16.msra.mxu1 %v1601_v62  ;;  %v1671_v61 = vld [vmem:[#allocation7 + $0x50] ss:$8 sps:$4 sm:$0xff]   ;;  %v1676_v62 = vld [vmem:[#allocation7 + $0x44] ss:$8 sps:$4 sm:$0xff]  }
  0x6d   :  { %779 = vmatprep.subr.bf16.mxu1 %v1605_v63  ;;  %v1674_v63 = vld [vmem:[#allocation7 + $0x40] ss:$8 sps:$4 sm:$0xff]  }
  0x6f   :  { %737 = vmatpush2.bf16.msra.mxu0 %v1604_v0  ;;  %v1679_v0 = vld [vmem:[#allocation7 + $0x34] ss:$8 sps:$4 sm:$0xff]  }
  0x70   :  { %738 = vmatprep.subr.bf16.mxu0 %v1608_v2  ;;  %780 = vmatpush2.bf16.msra.mxu1 %v1607_v1  ;;  %v1677_v1 = vld [vmem:[#allocation7 + $0x30] ss:$8 sps:$4 sm:$0xff]   ;;  %v1682_v2 = vld [vmem:[#allocation7 + $0x24] ss:$8 sps:$4 sm:$0xff]  }
  0x71   :  { %781 = vmatprep.subr.bf16.mxu1 %v1611_v4  ;;  %v1685_v4 = vld [vmem:[#allocation7 + $0x14] ss:$8 sps:$4 sm:$0xff]  }
  0x73   :  { %739 = vmatpush2.bf16.msra.mxu0 %v1610_v3  ;;  %v1680_v3 = vld [vmem:[#allocation7 + $0x20] ss:$8 sps:$4 sm:$0xff]  }
  0x74   :  { %794 = vmatprep.subr.bf16.mxu0 %v1616_v8  ;;  %782 = vmatpush2.bf16.msra.mxu1 %v1613_v6  ;;  %v1688_v6 = vld [vmem:[#allocation7 + $0x4] ss:$8 sps:$4 sm:$0xff]   ;;  %v1691_v8 = vld [vmem:[#allocation7 + $0xf4] ss:$8 sps:$4 sm:$0xff]  }
  0x75   :  { %851 = vmatprep.subr.bf16.mxu1 %v1661_v16  ;;  %v1703_v16 = vld [vmem:[#allocation7 + $0xb4] ss:$8 sps:$4 sm:$0xff]  }
  0x76   :  { %741 = vmatmul.mubr.bf16.vlgmr.msra.gmra.mxu0 %v97_v11  ;;  %v1692_v11 = vld [vmem:[#allocation7 + $0xe0] ss:$8 sps:$4 sm:$0xff]  }
  0x77   :  { %795 = vmatpush1.bf16.msra.mxu0 %v1614_v12  ;;  %784 = vmatmul.mubr.bf16.vlgmr.msra.gmra.mxu1 %v99_v13  ;;  %v1697_v12 = vld [vmem:[#allocation7 + $0xd4] ss:$8 sps:$4 sm:$0xff]   ;;  %v1695_v13 = vld [vmem:[#allocation7 + $0xd0] ss:$8 sps:$4 sm:$0xff]  }
  0x78   :  { %796 = vmatprep.subr.bf16.mxu0 %v1619_v14  ;;  %869 = vmatprep.mubr.bf16.mxu1 %v1847_v21  ;;  %v1700_v14 = vld [vmem:[#allocation7 + $0xc4] ss:$8 sps:$4 sm:$0xff]   ;;  %v1707_v21 = vld [vmem:[#allocation7 + $0x90] ss:$8 sps:$4 sm:$0xff]  }
  0x79   :  { %852 = vmatpush1.bf16.msra.mxu1 %v1659_v15  ;;  %826 = vmatprep.mubr.bf16.mxu0 %v102_v26  ;;  %v1698_v15 = vld [vmem:[#allocation7 + $0xc0] ss:$8 sps:$4 sm:$0xff]   ;;  %v1715_v26 = vld [vmem:[#allocation8 + $0x70] sm:$0xff]  }
  0x7a   :  { %1090 = vmatprep.subr.bf16.mxu1 %v1667_v57 }
  0x7b   :  { %797 = vmatpush1.bf16.msra.mxu0 %v1617_v17  ;;  %v1701_v17 = vld [vmem:[#allocation7 + $0xb0] ss:$8 sps:$4 sm:$0xff]  }
  0x7c   :  { %798 = vmatprep.subr.bf16.mxu0 %v1622_v18  ;;  %v1706_v18 = vld [vmem:[#allocation7 + $0xa4] ss:$8 sps:$4 sm:$0xff]  }
  0x7f   :  { %799 = vmatpush1.bf16.msra.mxu0 %v1620_v20  ;;  %1434 = vmatmul.mubr.msk.bf16.vlgmr.msra.gmra.mxu1 %vm704_vm0, %v103_v27  ;;  %v1709_v20 = vld [vmem:[#allocation7 + $0x94] ss:$8 sps:$4 sm:$0xff]  }
  0x80   :  { %800 = vmatprep.subr.bf16.mxu0 %v1625_v25  ;;  %1091 = vmatpush1.bf16.msra.mxu1 %v1665_v56  ;;  %v1714_v25 = vld [vmem:[#allocation8 + $0x38] sm:$0xff]   ;;  %v1716_v27 = vld [vmem:[#allocation8 + $0x30] sm:$0xff]  }
  0x81   :  { %1092 = vmatprep.subr.bf16.mxu1 %v1670_v58 }
  0x83   :  { %801 = vmatpush1.bf16.msra.mxu0 %v1623_v28  ;;  %v1717_v28 = vld [vmem:[#allocation8 + $0x68] sm:$0xff]  }
  0x84   :  { %802 = vmatprep.subr.bf16.mxu0 %v1628_v29  ;;  %1093 = vmatpush1.bf16.msra.mxu1 %v1668_v59  ;;  %v1718_v29 = vld [vmem:[#allocation8 + $0x28] sm:$0xff]  }
  0x85   :  { %1094 = vmatprep.subr.bf16.mxu1 %v1673_v60 }
  0x87   :  { %803 = vmatpush1.bf16.msra.mxu0 %v1626_v30  ;;  %v1719_v30 = vld [vmem:[#allocation8 + $0x60] sm:$0xff]  }
  0x88   :  { %804 = vmatprep.subr.bf16.mxu0 %v1631_v31  ;;  %1095 = vmatpush1.bf16.msra.mxu1 %v1671_v61  ;;  %v1720_v31 = vld [vmem:[#allocation8 + $0x20] sm:$0xff]  }
  0x89   :  { %1096 = vmatprep.subr.bf16.mxu1 %v1676_v62 }
  0x8b   :  { %805 = vmatpush1.bf16.msra.mxu0 %v1629_v32  ;;  %v1721_v32 = vld [vmem:[#allocation8 + $0x58] sm:$0xff]  }
  0x8c   :  { %806 = vmatprep.subr.bf16.mxu0 %v1634_v33  ;;  %1097 = vmatpush1.bf16.msra.mxu1 %v1674_v63  ;;  %v1722_v33 = vld [vmem:[#allocation8 + $0x18] sm:$0xff]  }
  0x8d   :  { %1098 = vmatprep.subr.bf16.mxu1 %v1679_v0 }
  0x8f   :  { %807 = vmatpush1.bf16.msra.mxu0 %v1632_v34  ;;  %v204_v34 = vlaneseq }
  0x90   :  { %808 = vmatprep.subr.bf16.mxu0 %v1637_v35  ;;  %1099 = vmatpush1.bf16.msra.mxu1 %v1677_v1 }
  0x91   :  { %1100 = vmatprep.subr.bf16.mxu1 %v1682_v2 }
  0x93   :  { %809 = vmatpush1.bf16.msra.mxu0 %v1635_v36  ;;  %v205_v36 = vshrl.u32 %v204_v34, 7 }
  0x94   :  { %810 = vmatprep.subr.bf16.mxu0 %v1640_v37  ;;  %1101 = vmatpush1.bf16.msra.mxu1 %v1680_v3 }
  0x95   :  { %1102 = vmatprep.subr.bf16.mxu1 %v1685_v4 }
  0x97   :  { %811 = vmatpush2.bf16.msra.mxu0 %v1638_v38 }
  0x98   :  { %812 = vmatprep.subr.bf16.mxu0 %v1643_v39  ;;  %1103 = vmatpush1.bf16.msra.mxu1 %v1683_v5  ;;  %v210_v39 = vsub.s32 1, %v205_v36 }
  0x99   :  { %1104 = vmatprep.subr.bf16.mxu1 %v1688_v6 }
  0x9b   :  { %813 = vmatpush2.bf16.msra.mxu0 %v1641_v40  ;;  %v202_v40 = vld [vmem:[%s1924_s2] sm:$0x3] }
  0x9c   :  { %814 = vmatprep.subr.bf16.mxu0 %v1646_v41  ;;  %1105 = vmatpush1.bf16.msra.mxu1 %v1686_v7  ;;  %v206_v41 = vsub.s32 0, %v205_v36 }
  0x9d   :  { %1106 = vmatprep.subr.bf16.mxu1 %v1691_v8 }
  0x9f   :  { %815 = vmatpush2.bf16.msra.mxu0 %v1644_v42 }
  0xa0   :  { %816 = vmatprep.subr.bf16.mxu0 %v1649_v43  ;;  %1107 = vmatpush2.bf16.msra.mxu1 %v1689_v9 }
  0xa1   :  { %1108 = vmatprep.subr.bf16.mxu1 %v1694_v10 }
  0xa3   :  { %817 = vmatpush2.bf16.msra.mxu0 %v1647_v44  ;;  %v211_v44 = vrot.slane %v202_v40, %v210_v39 }
  0xa4   :  { %818 = vmatprep.subr.bf16.mxu0 %v1652_v45  ;;  %1109 = vmatpush2.bf16.msra.mxu1 %v1692_v11  ;;  %v207_v45 = vrot.slane %v202_v40, %v206_v41 }
  0xa5   :  { %1110 = vmatprep.subr.bf16.mxu1 %v1697_v12 }
  0xa7   :  { %819 = vmatpush2.bf16.msra.mxu0 %v1650_v46 }
  0xa8   :  { %820 = vmatprep.subr.bf16.mxu0 %v1655_v47  ;;  %1111 = vmatpush2.bf16.msra.mxu1 %v1695_v13 }
  0xa9   :  { %1112 = vmatprep.subr.bf16.mxu1 %v1700_v14 }
  0xab   :  { %821 = vmatpush2.bf16.msra.mxu0 %v1653_v48 }
  0xac   :  { %822 = vmatprep.subr.bf16.mxu0 %v1658_v49  ;;  %1113 = vmatpush2.bf16.msra.mxu1 %v1698_v15  ;;  %v1723_v15 = vld [vmem:[#allocation8 + $0x50] sm:$0xff]  }
  0xad   :  { %1114 = vmatprep.subr.bf16.mxu1 %v1703_v16  ;;  %v1724_v16 = vld [vmem:[#allocation8 + $0x10] sm:$0xff]  }
  0xaf   :  { %823 = vmatpush2.bf16.msra.mxu0 %v1656_v50 }
  0xb0   :  { %824 = vmatprep.subr.bf16.mxu0 %v1664_v51  ;;  %1115 = vmatpush2.bf16.msra.mxu1 %v1701_v17  ;;  %v1725_v17 = vld [vmem:[#allocation8 + $0x48] sm:$0xff]  }
  0xb1   :  { %1116 = vmatprep.subr.bf16.mxu1 %v1706_v18  ;;  %v1726_v18 = vld [vmem:[#allocation8 + $0x8] sm:$0xff]  }
  0xb3   :  { %825 = vmatpush2.bf16.msra.mxu0 %v1662_v52 }
  0xb4   :  { %1117 = vmatpush2.bf16.msra.mxu1 %v1704_v19  ;;  %1484 = vmatprep.subr.bf16.mxu0 %v1713_v24  ;;  %v1727_v19 = vld [vmem:[#allocation8 + $0x40] sm:$0xff]  }
  0xb5   :  { %1118 = vmatprep.subr.bf16.mxu1 %v1709_v20  ;;  %v1728_v20 = vld [vmem:[#allocation8] sm:$0xff]  }
  0xb6   :  { %827 = vmatmul.mubr.bf16.vlgmr.msra.gmra.mxu0 %v101_v55 }
  0xb7   :  { %1485 = vmatpush3.bf16.msra.mxu0 %v1714_v25 }
  0xb8   :  { %1119 = vmatpush2.bf16.msra.mxu1 %v1707_v21  ;;  %1486 = vmatprep.subr.bf16.mxu0 %v1715_v26  ;;  %v918_v21 = vld [vmem:[%s1926_s4] sm:$0x3] }
  0xb9   :  { %1120 = vmatprep.subr.bf16.mxu1 %v1712_v22  ;;  %v923_v24 = vrot.slane %v918_v21, %v206_v41 }
  0xbb   :  { %1487 = vmatpush3.bf16.msra.mxu0 %v1716_v27 }
  0xbc   :  { %1121 = vmatpush2.bf16.msra.mxu1 %v1710_v23  ;;  %1488 = vmatprep.subr.bf16.mxu0 %v1717_v28  ;;  %v927_v23 = vrot.slane %v918_v21, %v210_v39  ;;  %v1467_v39 = vld [vmem:[%s1928_s6] ss:$0 sm:$0xff] }
  0xbf   :  { %1489 = vmatpush3.bf16.msra.mxu0 %v1718_v29 }
  0xc0   :  { %1490 = vmatprep.subr.bf16.mxu0 %v1719_v30 }
  0xc3   :  { %1491 = vmatpush3.bf16.msra.mxu0 %v1720_v31 }
  0xc4   :  { %1492 = vmatprep.subr.bf16.mxu0 %v1721_v32 }
  0xc7   :  { %1493 = vmatpush3.bf16.msra.mxu0 %v1722_v33 }
  0xc8   :  { %1494 = vmatprep.subr.bf16.mxu0 %v1723_v15 }
  0xcb   :  { %1495 = vmatpush3.bf16.msra.mxu0 %v1724_v16 }
  0xcc   :  { %1496 = vmatprep.subr.bf16.mxu0 %v1725_v17 }
  0xcf   :  { %1497 = vmatpush3.bf16.msra.mxu0 %v1726_v18 }
  0xd0   :  { %1498 = vmatprep.subr.bf16.mxu0 %v1727_v19 }
  0xd3   :  { %1499 = vmatpush3.bf16.msra.mxu0 %v1728_v20 }
 0x136   :  { %v742_v37 = vpop.f32.mrf.mxu0 }
 0x137   :  { %v785_v35 = vpop.f32.mrf.mxu1  ;;  %v743_v50 = vadd.f32 %v742_v37, %v207_v45 }
 0x138   :  { %v744_v42 = vpop.f32.mrf.mxu0 }
 0x139   :  { %v787_v38 = vpop.f32.mrf.mxu1  ;;  %v745_v49 = vadd.f32 %v744_v42, %v211_v44  ;;  %v786_v57 = vadd.f32 %v785_v35, %v743_v50 }
 0x13a   :  { %v746_v46 = vpop.f32.mrf.mxu0 }
 0x13b   :  { %v789_v43 = vpop.f32.mrf.mxu1  ;;  %v747_v52 = vadd.f32 %v746_v46, %v207_v45  ;;  %v788_v55 = vadd.f32 %v787_v38, %v745_v49 }
 0x13c   :  { %v748_v51 = vpop.f32.mrf.mxu0 }
 0x13d   :  { %v791_v47 = vpop.f32.mrf.mxu1  ;;  %v749_v56 = vadd.f32 %v748_v51, %v211_v44  ;;  %v790_v59 = vadd.f32 %v789_v43, %v747_v52 }
 0x13f   :  { %v871_v48 = vpop.f32.mrf.mxu1  ;;  %v792_v0 = vadd.f32 %v791_v47, %v749_v56 }
 0x141   :  { %v873_v53 = vpop.f32.mrf.mxu1 }
 0x143   :  { %v875_v62 = vpop.f32.mrf.mxu1 }
 0x145   :  { %v877_v7 = vpop.f32.mrf.mxu1 }
 0x176   :  { %v828_v54 = vpop.f32.mrf.mxu0 }
 0x177   :  { %v829_v61 = vadd.f32 %v828_v54, %v786_v57 }
 0x178   :  { %v830_v58 = vpop.f32.mrf.mxu0 }
 0x179   :  { %v831_v60 = vadd.f32 %v830_v58, %v788_v55  ;;  %v872_v6 = vadd.f32 %v871_v48, %v829_v61 }
 0x17a   :  { %v832_v63 = vpop.f32.mrf.mxu0 }
 0x17b   :  { %v833_v1 = vadd.f32 %v832_v63, %v790_v59  ;;  %v874_v3 = vadd.f32 %v873_v53, %v831_v60  ;;  %v880_v12 = vmax.f32 %v872_v6, 0.0 }
 0x17c   :  { %v834_v2 = vpop.f32.mrf.mxu0 }
 0x17d   :  { %v876_v4 = vadd.f32 %v875_v62, %v833_v1  ;;  %v835_v5 = vadd.f32 %v834_v2, %v792_v0  ;;  %v881_v10 = vmax.f32 %v874_v3, 0.0 }
 0x17f   :  { %v878_v8 = vadd.f32 %v877_v7, %v835_v5  ;;  %v882_v9 = vmax.f32 %v876_v4, 0.0 }
 0x181   :  { %v883_v11 = vmax.f32 %v878_v8, 0.0  ;;  %v884_v14 = vpack.c.bf16 %v882_v9, %v880_v12 }
 0x183   :  { %v885_v13 = vpack.c.bf16 %v883_v11, %v881_v10 }
 0x185   :  { %1122 = vmatprep.mubr.bf16.mxu1 %v885_v13 }
 0x186   :  { %1123 = vmatmul.mubr.bf16.vlgmr.msra.gmra.mxu1 %v884_v14 }
 0x246   :  { %v1124_v22 = vpop.f32.mrf.mxu1 }
 0x247   :  { %v1125_v29 = vadd.f32 %v1124_v22, %v923_v24 }
 0x248   :  { %v1126_v25 = vpop.f32.mrf.mxu1 }
 0x249   :  { %v1127_v27 = vadd.f32 %v1126_v25, %v927_v23  ;;  %v1133_v35 = vmax.f32 %v1125_v29, 0.0 }
 0x24a   :  { %v1128_v26 = vpop.f32.mrf.mxu1 }
 0x24b   :  { %v1129_v28 = vadd.f32 %v1128_v26, %v923_v24  ;;  %v1134_v33 = vmax.f32 %v1127_v27, 0.0 }
 0x24c   :  { %v1130_v30 = vpop.f32.mrf.mxu1 }
 0x24d   :  { %v1131_v31 = vadd.f32 %v1130_v30, %v927_v23  ;;  %v1135_v32 = vmax.f32 %v1129_v28, 0.0 }
 0x24f   :  { %v1136_v34 = vmax.f32 %v1131_v31, 0.0  ;;  %v1137_v37 = vpack.c.bf16 %v1135_v32, %v1133_v35 }
 0x251   :  { %v1138_v36 = vpack.c.bf16 %v1136_v34, %v1134_v33 }
 0x253   :  { %1306 = vmatprep.mubr.bf16.mxu0 %v1138_v36 }
 0x254   :  { %1307 = vmatmul.mubr.bf16.vlgmr.msra.gmra.mxu0 %v1137_v37 }
 0x314   :  { %v1500_v38 = vpop.f32.mrf.mxu0 }
 0x316   :  { %v1501_v40 = vpop.f32.mrf.mxu0 }
 0x317   :  { %v1502_v41 = vadd.f32 %v1501_v40, %v1500_v38 }
 0x318   :  { %v1503_v42 = vpop.f32.mrf.mxu0 }
 0x319   :  { %v1309_v43 = vadd.f32 %v1502_v41, %v1467_v39 }
 0x31a   :  { %v1504_v44 = vpop.f32.mrf.mxu0 }
 0x31b   :  { %1315 = vst [vmem:[#allocation10] sm:$0xff] %v1309_v43  ;;  %v1505_v45 = vadd.f32 %v1504_v44, %v1503_v42 }
 0x31d   :  { %v1312_v46 = vadd.f32 %v1505_v45, %v1467_v39 }
 0x31f   :  { %1316 = vst [vmem:[#allocation10 + $0x8] sm:$0xff] %v1312_v46 }
 0x320   :  { %1820 = shalt.err (!%p1817_p10)
}
 0x321   :  { %1328 = dma.vmem_to_hbm [thread:$0]  %s1323_s30, 256, %s1929_s7, [#allocation4], %s1838_s27, %s1838_s27, %s1839_s28  }
 0x322   :  { %1835 = dma.done.wait [#allocation4], 256  }
 0x323   :  { %1836 = vsyncadd [#allocation4], 4294967040 }
 0x324   :  { %1332 = vsyncpa [#allocation3], 1 }
 0x325   :  { %1333 = vsyncpa [#allocation6], 1 }
 0x326   :  { %1334 = vsyncpa [#allocation9], 1 }
 0x327   :  { %1335 = vsyncpa [#allocation4], 1 }

</bundles_post_ra>
